<compile_context>
chip_gen: v7x
topology: tpu7x:2x2x1
jax: 0.10.0
libtpu: 0.0.40
codegen_flags: <defaults>
</compile_context>

<pallas_src>
import jax
import jax.numpy as jnp
from jax.experimental import pallas as pl
from jax.experimental.pallas import tpu as pltpu


def _round_up(x, m):
    return (x + m - 1) // m * m


def _pad_rows(m):
    """Pad the (b*t) row count to a tile-friendly multiple."""
    if m >= 512:
        return _round_up(m, 256)
    if m >= 128:
        return _round_up(m, 128)
    return _round_up(m, 16)  # bf16 sublane packing (16 rows / vreg)


# ---------------------------------------------------------------------------
# Kernels
# ---------------------------------------------------------------------------
def _embed_kernel(x_ref, w_ref, add_ref, o_ref):
    """Single-K-block step: out = x @ w + (bias + time pos-emb).

    x_ref:   (tm, K_p)  bf16
    w_ref:   (K_p, tn)  bf16
    add_ref: (tm, tn)   f32   (bias + per-row time positional embedding)
    o_ref:   (tm, tn)   f32
    """
    o_ref[...] = (
        jnp.dot(x_ref[...], w_ref[...], preferred_element_type=jnp.float32)
        + add_ref[...]
    ).astype(o_ref.dtype)


def _embed_kernel_ktiled(x_ref, w_ref, add_ref, o_ref, acc_ref):
    """K-tiled accumulator variant (only used when the full-K weight strip
    does not fit the VMEM block budget, e.g. very large frames on v7x)."""
    k = pl.program_id(2)

    @pl.when(k == 0)
    def _():
        acc_ref[...] = jnp.zeros_like(acc_ref)

    acc_ref[...] += jnp.dot(
        x_ref[...], w_ref[...], preferred_element_type=jnp.float32
    )

    @pl.when(k == pl.num_programs(2) - 1)
    def _():
        o_ref[...] = (acc_ref[...] + add_ref[...]).astype(o_ref.dtype)


# ---------------------------------------------------------------------------
# pallas_call wrapper
# ---------------------------------------------------------------------------
_VMEM_LIMIT = 48 * 1024 * 1024     # safe on v5e/v6e (128 MiB) and v7x (64 MiB)
_BLOCK_BUDGET = 40 * 1024 * 1024   # double-buffered block budget (headroom)


def _blocks_fit(tm, tk, tn):
    w_bytes = 2 * tk * tn * 2      # bf16 weight, double-buffered
    x_bytes = 2 * tm * tk * 2      # bf16 activations, double-buffered
    add_bytes = 2 * tm * tn * 4    # f32 addend, double-buffered
    out_bytes = 2 * tm * tn * 4    # f32 output, double-buffered
    acc_bytes = tm * tn * 4        # f32 accumulator scratch (K-tiled path)
    return w_bytes + x_bytes + add_bytes + out_bytes + acc_bytes <= _BLOCK_BUDGET


def _frame_embed(x, weight, addend):
    """x: (M_p, K_p) bf16, weight: (K_p, N_p) bf16, addend: (M_p, N_p) f32
    -> (M_p, N_p) f32."""
    M_p, K_p = x.shape
    K_w, N_p = weight.shape
    assert K_w == K_p and addend.shape == (M_p, N_p)
    assert K_p % 128 == 0 and N_p % 128 == 0 and M_p % 8 == 0

    # --- M tile: MXU-sized when b*t is large, single padded tile otherwise.
    if M_p >= 512 and M_p % 256 == 0:
        tm = 256
    elif M_p >= 128 and M_p % 128 == 0:
        tm = 128
    else:
        tm = M_p
    m_tiles = M_p // tm

    # --- N tile: single tile when the embedding is narrow (so the activation
    # strip is streamed from HBM exactly once).
    if N_p <= 512:
        tn = N_p
    elif N_p % 256 == 0:
        tn = 256
    else:
        tn = 128
    n_tiles = N_p // tn

    # --- K tile: largest 128-multiple divisor of K_p whose blocks fit VMEM.
    n_chunks = K_p // 128
    tk = None
    for s in range(1, n_chunks + 1):
        if n_chunks % s:
            continue
        cand = K_p // s
        if _blocks_fit(tm, cand, tn):
            tk = cand
            break
    assert tk is not None, "no K tile fits the VMEM block budget"
    k_tiles = K_p // tk

    flops = 2 * M_p * K_p * N_p
    bytes_accessed = (
        M_p * K_p * 2 * n_tiles      # bf16 activations, re-read per N tile
        + K_p * N_p * 2 * m_tiles    # bf16 weight, re-read per M tile
        + M_p * N_p * 4              # f32 addend read
        + M_p * N_p * 4              # f32 output writeback
    )
    cost = pl.CostEstimate(
        flops=flops, transcendentals=0, bytes_accessed=bytes_accessed
    )

    if k_tiles == 1:
        # Fast path: no K grid axis, no accumulator scratch, no branching.
        return pl.pallas_call(
            _embed_kernel,
            out_shape=jax.ShapeDtypeStruct((M_p, N_p), jnp.float32),
            grid_spec=pltpu.PrefetchScalarGridSpec(
                num_scalar_prefetch=0,
                grid=(m_tiles, n_tiles),
                in_specs=[
                    pl.BlockSpec((tm, K_p), lambda m, n: (m, 0)),
                    pl.BlockSpec((K_p, tn), lambda m, n: (0, n)),
                    pl.BlockSpec((tm, tn), lambda m, n: (m, n)),
                ],
                out_specs=pl.BlockSpec((tm, tn), lambda m, n: (m, n)),
            ),
            compiler_params=pltpu.CompilerParams(
                dimension_semantics=("parallel", "parallel"),
                vmem_limit_bytes=_VMEM_LIMIT,
            ),
            cost_estimate=cost,
        )(x, weight, addend)

    # K-tiled accumulator path (reduction axis last).
    return pl.pallas_call(
        _embed_kernel_ktiled,
        out_shape=jax.ShapeDtypeStruct((M_p, N_p), jnp.float32),
        grid_spec=pltpu.PrefetchScalarGridSpec(
            num_scalar_prefetch=0,
            grid=(m_tiles, n_tiles, k_tiles),
            in_specs=[
                pl.BlockSpec((tm, tk), lambda m, n, k: (m, k)),
                pl.BlockSpec((tk, tn), lambda m, n, k: (k, n)),
                pl.BlockSpec((tm, tn), lambda m, n, k: (m, n)),
            ],
            out_specs=pl.BlockSpec((tm, tn), lambda m, n, k: (m, n)),
            scratch_shapes=[pltpu.VMEM((tm, tn), jnp.float32)],
        ),
        compiler_params=pltpu.CompilerParams(
            dimension_semantics=("parallel", "parallel", "arbitrary"),
            vmem_limit_bytes=_VMEM_LIMIT,
        ),
        cost_estimate=cost,
    )(x, weight, addend)


# ---------------------------------------------------------------------------
# Module wrapper
# ---------------------------------------------------------------------------
class AcceptVideoWrapperPallas:
    """JAX/Pallas port of AcceptVideoWrapper with a synthetic image_net
    (Flatten -> Linear(c*h*w, dim_emb)), add_time_pos_emb=True."""

    def __init__(self, key, *, channels, height, width, dim_emb, time_seq_len):
        self.dim_emb = dim_emb
        self.time_seq_len = time_seq_len
        self.d_in = channels * height * width
        # Lane-dense padded dims (zero padding, sliced off at the end).
        self.d_emb_p = _round_up(dim_emb, 128)
        self.K_p = _round_up(self.d_in, 128)

        k_w, k_b, k_p = jax.random.split(key, 3)
        w = jax.random.normal(k_w, (self.d_in, dim_emb), jnp.float32) * 0.02
        bias = jax.random.normal(k_b, (dim_emb,), jnp.float32) * 0.02
        # Matches PyTorch: Parameter(randn(time_seq_len, dim_emb) * 0.01)
        pos = jax.random.normal(k_p, (time_seq_len, dim_emb), jnp.float32) * 0.01

        # bf16 MXU weight, padded to (K_p, d_emb_p); epilogue params stay f32.
        self.weight = jnp.pad(
            w, ((0, self.K_p - self.d_in), (0, self.d_emb_p - dim_emb))
        ).astype(jnp.bfloat16)
        self.bias = jnp.pad(bias, (0, self.d_emb_p - dim_emb)).reshape(
            1, self.d_emb_p
        )
        self.pos_emb = jnp.pad(pos, ((0, 0), (0, self.d_emb_p - dim_emb)))

    def __call__(self, video):
        # video: (b, c, t, h, w) float32 (NCTHW, same layout as PyTorch).
        b, c, t, h, w = video.shape
        assert t <= self.time_seq_len, (
            f"received video with {t} frames but time_seq_len "
            f"({self.time_seq_len}) is too low"
        )
        assert c * h * w == self.d_in
        M = b * t
        M_p = _pad_rows(M)

        # One-time rearrange (b c t h w) -> (b t c h w) -> (b*t, c*h*w); cast
        # to bf16 (halves the activation HBM stream) and zero-pad to tiles.
        frames = jnp.transpose(video, (0, 2, 1, 3, 4)).reshape(M, self.d_in)
        x = jnp.pad(
            frames.astype(jnp.bfloat16),
            ((0, M_p - M), (0, self.K_p - self.d_in)),
        )

        # Fused epilogue addend: bias + per-row time positional embedding
        # (row r of the (b*t) layout gets pos_emb[r % t]).
        addend = self.bias + jnp.tile(self.pos_emb[:t], (b, 1))
        addend = jnp.pad(addend, ((0, M_p - M), (0, 0)))

        out_p = _frame_embed(x, self.weight, addend)
        # Drop row/column padding, restore (b, t, dim_emb).
        return out_p[:M, : self.dim_emb].reshape(b, t, self.dim_emb)

    def reference(self, video):
        # Pure-JAX reference with the same bf16-operand / f32-accumulate math.
        b, c, t, h, w = video.shape
        frames = jnp.transpose(video, (0, 2, 1, 3, 4)).reshape(b * t, c * h * w)
        emb = jnp.dot(
            frames.astype(jnp.bfloat16),
            self.weight[: self.d_in, : self.dim_emb],
            preferred_element_type=jnp.float32,
        )
        emb = emb + self.bias[:, : self.dim_emb]
        emb = emb.reshape(b, t, self.dim_emb)
        return emb + self.pos_emb[None, :t, : self.dim_emb]


if __name__ == "__main__":
    key = jax.random.PRNGKey(0)
    k_video, k_params = jax.random.split(key)

    B, C, T, H, W = 2, 4, 6, 16, 16
    DIM_EMB, TIME_SEQ_LEN = 32, 8

    video = jax.random.normal(k_video, (B, C, T, H, W), jnp.float32)

    model = AcceptVideoWrapperPallas(
        k_params, channels=C, height=H, width=W,
        dim_emb=DIM_EMB, time_seq_len=TIME_SEQ_LEN)

    out = jax.block_until_ready(model(video))
    ref = model.reference(video)

    assert out.shape == (B, T, DIM_EMB), out.shape
    assert jnp.allclose(out, ref, atol=2e-3, rtol=2e-3), "mismatch vs reference"

    print("KERNEL_OK")
</pallas_src>

<mosaic_0001>
module attributes {stable_mosaic.version = 11 : i64} {
  func.func @_embed_kernel(%arg0: i32, %arg1: i32, %arg2: memref<16x1024xbf16, #tpu.memory_space<vmem>>, %arg3: memref<1024x128xbf16, #tpu.memory_space<vmem>>, %arg4: memref<16x128xf32, #tpu.memory_space<vmem>>, %arg5: memref<16x128xf32, #tpu.memory_space<vmem>>) attributes {dimension_semantics = [#tpu.dimension_semantics<parallel>, #tpu.dimension_semantics<parallel>], iteration_bounds = array<i64: 1, 1>, scalar_prefetch = 0 : i64, scratch_operands = 0 : i64, tpu.core_type = #tpu.core_type<tc>, window_params = [{transform_indices = @transform_0, window_bounds = array<i64: 16, 1024>}, {transform_indices = @transform_1, window_bounds = array<i64: 1024, 128>}, {transform_indices = @transform_2, window_bounds = array<i64: 16, 128>}, {transform_indices = @transform_3, window_bounds = array<i64: 16, 128>}]} {
    %c0 = arith.constant 0 : index
    %c0_0 = arith.constant 0 : index
    %0 = vector.load %arg2[%c0, %c0_0] : memref<16x1024xbf16, #tpu.memory_space<vmem>>, vector<16x1024xbf16>
    %c0_1 = arith.constant 0 : index
    %c0_2 = arith.constant 0 : index
    %1 = vector.load %arg3[%c0_1, %c0_2] : memref<1024x128xbf16, #tpu.memory_space<vmem>>, vector<1024x128xbf16>
    %cst = arith.constant dense<0.000000e+00> : vector<16x128xf32>
    %2 = tpu.matmul %0, %1, %cst {dimension_numbers = #tpu.dot_dimension_numbers<[1], [0], [0], [1], [0, 0, 1, 1], [], []>} : vector<16x1024xbf16>, vector<1024x128xbf16>, vector<16x128xf32> -> vector<16x128xf32>
    %c0_3 = arith.constant 0 : index
    %c0_4 = arith.constant 0 : index
    %3 = vector.load %arg4[%c0_3, %c0_4] : memref<16x128xf32, #tpu.memory_space<vmem>>, vector<16x128xf32>
    %4 = arith.addf %2, %3 : vector<16x128xf32>
    %c0_5 = arith.constant 0 : index
    %c0_6 = arith.constant 0 : index
    %5 = vector.load %arg5[%c0_5, %c0_6] : memref<16x128xf32, #tpu.memory_space<vmem>>, vector<16x128xf32>
    tpu.vector_store %arg5[%c0_5, %c0_6], %4 {strides = array<i32>} : memref<16x128xf32, #tpu.memory_space<vmem>>, vector<16x128xf32>,
    return
  }
  func.func @transform_0(%arg0: i32, %arg1: i32) -> (i32, i32) {
    %c0_i32 = arith.constant 0 : i32
    %c0_i32_0 = arith.constant 0 : i32
    return %arg0, %c0_i32 : i32, i32
  }
  func.func @transform_1(%arg0: i32, %arg1: i32) -> (i32, i32) {
    %c0_i32 = arith.constant 0 : i32
    %c0_i32_0 = arith.constant 0 : i32
    return %c0_i32, %arg1 : i32, i32
  }
  func.func @transform_2(%arg0: i32, %arg1: i32) -> (i32, i32) {
    %c0_i32 = arith.constant 0 : i32
    return %arg0, %arg1 : i32, i32
  }
  func.func @transform_3(%arg0: i32, %arg1: i32) -> (i32, i32) {
    %c0_i32 = arith.constant 0 : i32
    return %arg0, %arg1 : i32, i32
  }
}

</mosaic_0001>

<bundles_post_ra>
// kernel: tpu_custom_call.1
= control target key start
LH: loop header
LB: loop body
LE: loop exit
PB: predicated region body
PF: predicated region fallthrough
CT: control target
= control target key end

     0   :  { %8 = vsyncpa [#allocation3], 0  ;;  %s1215_s0 = inlined_call_operand.hbm [shape: bf16[16,1024], index: 0, kind: input, shape index: {}]   ;;  %s1216_s1 = inlined_call_operand.hbm [shape: bf16[1024,128], index: 1, kind: input, shape index: {}]   ;;  %s1217_s2 = inlined_call_operand.hbm [shape: f32[16,128], index: 2, kind: input, shape index: {}]   ;;  %s1218_s3 = inlined_call_operand.hbm [shape: f32[16,128], index: 3, kind: output, shape index: {}]  }
   0x1   :  { %9 = vsyncpa [#allocation6], 0 }
   0x2   :  { %10 = vsyncpa [#allocation4], 0  ;;  %s1131_s12 = smov [#allocation5]   ;;  %s1037_s16 = scalar_lea.hbm %s1216_s1, 8192 }
   0x3   :  { %s28_s13 = sshll.u32 %s1131_s12, 4  ;;  %p1038_p0 = scmp.ne.s32.totalorder %s1216_s1, %s1037_s16  ;;  %s29_s13 = int_to_ptr.vmem [resolvable:$true] %s28_s13 }
   0x4   :  { %p1041_p1 = scmp.lt.u32.totalorder %s1037_s16, %s1216_s1 }
   0x6   :  { %p1043_p2 = pnand %p1041_p1, %p1038_p0 }
   0x8   :  { %1046 = shalt.err (!%p1043_p2)
}
   0x9   :  { %s1047_s21 = scalar_lea.vmem %s29_s13, 8192  ;;  %p1052_p4 = scmp.lt.s32.totalorder %s29_s13, %s29_s13 }
   0xa   :  { %p1048_p3 = scmp.ne.s32.totalorder %s29_s13, %s1047_s21  ;;  %p1053_p5 = scmp.lt.s32.totalorder %s1047_s21, %s1047_s21 }
   0xc   :  { %p1054_p6 = por %p1053_p5, %p1052_p4 }
   0xe   :  { %p1055_p7 = pnand %p1054_p6, %p1048_p3 }
  0x10   :  { %1058 = shalt.err (!%p1055_p7)
}
  0x11   :  { %s1132_s22 = smov 64   ;;  %s1133_s23 = smov 4  }
  0x12   :  { %34 = dma.hbm_to_vmem [thread:$0]  %s1216_s1, 8192, %s29_s13, [#allocation6], %s1132_s22, %s1132_s22, %s1133_s23  }
  0x13   :  { %s1134_s26 = smov [#allocation2]   ;;  %s1059_s30 = scalar_lea.hbm %s1215_s0, 1024 }
  0x14   :  { %s16_s27 = sshll.u32 %s1134_s26, 4  ;;  %p1060_p8 = scmp.ne.s32.totalorder %s1215_s0, %s1059_s30  ;;  %s17_s27 = int_to_ptr.vmem [resolvable:$true] %s16_s27 }
  0x15   :  { %p1063_p9 = scmp.lt.u32.totalorder %s1059_s30, %s1215_s0 }
  0x17   :  { %p1065_p10 = pnand %p1063_p9, %p1060_p8 }
  0x19   :  { %1068 = shalt.err (!%p1065_p10)
}
  0x1a   :  { %s1069_s8 = scalar_lea.vmem %s17_s27, 1024  ;;  %p1074_p12 = scmp.lt.s32.totalorder %s17_s27, %s17_s27 }
  0x1b   :  { %p1070_p11 = scmp.ne.s32.totalorder %s17_s27, %s1069_s8  ;;  %p1075_p13 = scmp.lt.s32.totalorder %s1069_s8, %s1069_s8 }
  0x1d   :  { %p1076_p0 = por %p1075_p13, %p1074_p12 }
  0x1f   :  { %p1077_p1 = pnand %p1076_p0, %p1070_p11 }
  0x21   :  { %1080 = shalt.err (!%p1077_p1)
}
  0x22   :  { %s1135_s1 = smov 512   ;;  %s1136_s9 = smov 32  }
  0x23   :  { %22 = dma.hbm_to_vmem [thread:$0]  %s1215_s0, 1024, %s17_s27, [#allocation3], %s1135_s1, %s1135_s1, %s1136_s9  }
  0x24   :  { %s1137_s12 = smov [#allocation7]   ;;  %s1081_s16 = scalar_lea.hbm %s1217_s2, 256 }
  0x25   :  { %s40_s13 = sshll.u32 %s1137_s12, 4  ;;  %p1082_p2 = scmp.ne.s32.totalorder %s1217_s2, %s1081_s16  ;;  %s41_s13 = int_to_ptr.vmem [resolvable:$true] %s40_s13 }
  0x26   :  { %p1085_p3 = scmp.lt.u32.totalorder %s1081_s16, %s1217_s2 }
  0x28   :  { %p1087_p4 = pnand %p1085_p3, %p1082_p2 }
  0x2a   :  { %1090 = shalt.err (!%p1087_p4)
}
  0x2b   :  { %s1091_s21 = scalar_lea.vmem %s41_s13, 256  ;;  %p1096_p6 = scmp.lt.s32.totalorder %s41_s13, %s41_s13 }
  0x2c   :  { %p1092_p5 = scmp.ne.s32.totalorder %s41_s13, %s1091_s21  ;;  %p1097_p7 = scmp.lt.s32.totalorder %s1091_s21, %s1091_s21 }
  0x2e   :  { %p1098_p8 = por %p1097_p7, %p1096_p6 }
  0x30   :  { %p1099_p9 = pnand %p1098_p8, %p1092_p5 }
  0x32   :  { %1102 = shalt.err (!%p1099_p9)
}
  0x33   :  { %s1138_s0 = smov 128   ;;  %s1139_s22 = smov 8  }
  0x34   :  { %46 = dma.hbm_to_vmem [thread:$0]  %s1217_s2, 256, %s41_s13, [#allocation6], %s1138_s0, %s1138_s0, %s1139_s22  }
  0x35   :  { %1125 = dma.done.wait [#allocation3], 1024  }
  0x36   :  { %1126 = vsyncadd [#allocation3], 4294966272 }
  0x37   :  { %1127 = dma.done.wait [#allocation6], 8448  }
  0x38   :  { %1128 = vsyncadd [#allocation6], 4294958848  ;;  %v973_v0 = vld [vmem:[#allocation5 + $0x40] sm:$0xff]   ;;  %v977_v4 = vld [vmem:[#allocation5 + $0x48] sm:$0xff]   ;;  %s1140_s2 = smov [#allocation8]  }
  0x39   :  { %v974_v1 = vld [vmem:[#allocation5 + $0xc0] sm:$0xff]   ;;  %875 = vmatprep.subr.bf16.mxu0 %v973_v0  ;;  %v978_v5 = vld [vmem:[#allocation5 + $0xc8] sm:$0xff]   ;;  %v981_v8 = vld [vmem:[#allocation5 + $0x50] sm:$0xff]   ;;  %s790_s25 = sshll.u32 %s1140_s2, 4  ;;  %s791_s25 = int_to_ptr.vmem [resolvable:$true] %s790_s25 }
  0x3a   :  { %v975_v2 = vld [vmem:[#allocation5] sm:$0xff]   ;;  %897 = vmatprep.subr.bf16.mxu1 %v974_v1  ;;  %v979_v6 = vld [vmem:[#allocation5 + $0x8] sm:$0xff]   ;;  %v982_v9 = vld [vmem:[#allocation5 + $0xd0] sm:$0xff]   ;;  %s1103_s26 = scalar_lea.vmem %s791_s25, 256  ;;  %p1108_p11 = scmp.lt.s32.totalorder %s791_s25, %s791_s25 }
  0x3b   :  { %v976_v3 = vld [vmem:[#allocation5 + $0x80] sm:$0xff]   ;;  %876 = vmatpush3.bf16.msra.mxu0 %v975_v2  ;;  %v980_v7 = vld [vmem:[#allocation5 + $0x88] sm:$0xff]   ;;  %v983_v10 = vld [vmem:[#allocation5 + $0x10] sm:$0xff]   ;;  %p1104_p10 = scmp.ne.s32.totalorder %s791_s25, %s1103_s26  ;;  %p1109_p12 = scmp.lt.s32.totalorder %s1103_s26, %s1103_s26 }
  0x3c   :  { %898 = vmatpush3.bf16.msra.mxu1 %v976_v3  ;;  %877 = vmatprep.subr.bf16.mxu0 %v977_v4  ;;  %v984_v11 = vld [vmem:[#allocation5 + $0x90] sm:$0xff]   ;;  %v985_v12 = vld [vmem:[#allocation5 + $0x58] sm:$0xff]   ;;  %v989_v16 = vld [vmem:[#allocation5 + $0x60] sm:$0xff]  }
  0x3d   :  { %899 = vmatprep.subr.bf16.mxu1 %v978_v5  ;;  %v986_v13 = vld [vmem:[#allocation5 + $0xd8] sm:$0xff]   ;;  %v990_v17 = vld [vmem:[#allocation5 + $0xe0] sm:$0xff]   ;;  %v993_v20 = vld [vmem:[#allocation5 + $0x68] sm:$0xff]   ;;  %p1110_p13 = por %p1109_p12, %p1108_p11 }
  0x3e   :  { %v987_v14 = vld [vmem:[#allocation5 + $0x18] sm:$0xff]   ;;  %v991_v18 = vld [vmem:[#allocation5 + $0x20] sm:$0xff]   ;;  %v994_v21 = vld [vmem:[#allocation5 + $0xe8] sm:$0xff]  }
  0x3f   :  { %878 = vmatpush3.bf16.msra.mxu0 %v979_v6  ;;  %v988_v15 = vld [vmem:[#allocation5 + $0x98] sm:$0xff]   ;;  %v992_v19 = vld [vmem:[#allocation5 + $0xa0] sm:$0xff]   ;;  %v995_v22 = vld [vmem:[#allocation5 + $0x28] sm:$0xff]   ;;  %p1111_p0 = pnand %p1110_p13, %p1104_p10 }
  0x40   :  { %900 = vmatpush3.bf16.msra.mxu1 %v980_v7  ;;  %879 = vmatprep.subr.bf16.mxu0 %v981_v8  ;;  %v996_v23 = vld [vmem:[#allocation5 + $0xa8] sm:$0xff]   ;;  %v997_v24 = vld [vmem:[#allocation5 + $0x70] sm:$0xff]   ;;  %v1001_v28 = vld [vmem:[#allocation5 + $0x78] sm:$0xff]  }
  0x41   :  { %901 = vmatprep.subr.bf16.mxu1 %v982_v9  ;;  %v998_v25 = vld [vmem:[#allocation5 + $0xf0] sm:$0xff]   ;;  %v1002_v29 = vld [vmem:[#allocation5 + $0xf8] sm:$0xff]   ;;  %v57_v32 = vld [vmem:[#allocation2] sm:$0xff] }
  0x42   :  { %v999_v26 = vld [vmem:[#allocation5 + $0x30] sm:$0xff]   ;;  %v1003_v30 = vld [vmem:[#allocation5 + $0x38] sm:$0xff]   ;;  %v61_v33 = vld [vmem:[#allocation2 + $0x20] sm:$0xff] }
  0x43   :  { %880 = vmatpush3.bf16.msra.mxu0 %v983_v10  ;;  %v1000_v27 = vld [vmem:[#allocation5 + $0xb0] sm:$0xff]   ;;  %v1004_v31 = vld [vmem:[#allocation5 + $0xb8] sm:$0xff]   ;;  %v58_v34 = vld [vmem:[#allocation2 + $0x8] sm:$0xff]  ;;  %v803_v35 = vcombine.low %v57_v32, %v61_v33  ;;  %v804_v36 = vcombine.high %v57_v32, %v61_v33 }
  0x44   :  { %902 = vmatpush3.bf16.msra.mxu1 %v984_v11  ;;  %881 = vmatprep.subr.bf16.mxu0 %v985_v12  ;;  %v62_v37 = vld [vmem:[#allocation2 + $0x28] sm:$0xff]  ;;  %v1005_v40 = vld [vmem:[#allocation5 + $0x140] sm:$0xff]   ;;  %v1013_v48 = vld [vmem:[#allocation5 + $0x150] sm:$0xff]  }
  0x45   :  { %903 = vmatprep.subr.bf16.mxu1 %v986_v13  ;;  %v805_v38 = vcombine.low %v58_v34, %v62_v37  ;;  %v806_v39 = vcombine.high %v58_v34, %v62_v37  ;;  %651 = vmatprep.mubr.bf16.mxu0 %v804_v36  ;;  %v1006_v41 = vld [vmem:[#allocation5 + $0x1c0] sm:$0xff]   ;;  %v1009_v44 = vld [vmem:[#allocation5 + $0x148] sm:$0xff]   ;;  %v1014_v49 = vld [vmem:[#allocation5 + $0x1d0] sm:$0xff]  }
  0x46   :  { %v1007_v42 = vld [vmem:[#allocation5 + $0x100] sm:$0xff]   ;;  %v1010_v45 = vld [vmem:[#allocation5 + $0x1c8] sm:$0xff]   ;;  %v1015_v50 = vld [vmem:[#allocation5 + $0x110] sm:$0xff]  }
  0x47   :  { %882 = vmatpush3.bf16.msra.mxu0 %v987_v14  ;;  %692 = vmatprep.mubr.bf16.mxu1 %v806_v39  ;;  %v1008_v43 = vld [vmem:[#allocation5 + $0x180] sm:$0xff]   ;;  %v1011_v46 = vld [vmem:[#allocation5 + $0x108] sm:$0xff]   ;;  %v1016_v51 = vld [vmem:[#allocation5 + $0x190] sm:$0xff]  }
  0x48   :  { %904 = vmatpush3.bf16.msra.mxu1 %v988_v15  ;;  %883 = vmatprep.subr.bf16.mxu0 %v989_v16  ;;  %v1012_v47 = vld [vmem:[#allocation5 + $0x188] sm:$0xff]   ;;  %v1017_v52 = vld [vmem:[#allocation5 + $0x158] sm:$0xff]   ;;  %v1021_v56 = vld [vmem:[#allocation5 + $0x160] sm:$0xff]  }
  0x49   :  { %905 = vmatprep.subr.bf16.mxu1 %v990_v17  ;;  %v1018_v53 = vld [vmem:[#allocation5 + $0x1d8] sm:$0xff]   ;;  %v1022_v57 = vld [vmem:[#allocation5 + $0x1e0] sm:$0xff]   ;;  %v1025_v60 = vld [vmem:[#allocation5 + $0x168] sm:$0xff]  }
  0x4a   :  { %v1019_v54 = vld [vmem:[#allocation5 + $0x118] sm:$0xff]   ;;  %v1023_v58 = vld [vmem:[#allocation5 + $0x120] sm:$0xff]   ;;  %v1026_v61 = vld [vmem:[#allocation5 + $0x1e8] sm:$0xff]  }
  0x4b   :  { %884 = vmatpush3.bf16.msra.mxu0 %v991_v18  ;;  %v1020_v55 = vld [vmem:[#allocation5 + $0x198] sm:$0xff]   ;;  %v1024_v59 = vld [vmem:[#allocation5 + $0x1a0] sm:$0xff]   ;;  %v1027_v62 = vld [vmem:[#allocation5 + $0x128] sm:$0xff]  }
  0x4c   :  { %906 = vmatpush3.bf16.msra.mxu1 %v992_v19  ;;  %885 = vmatprep.subr.bf16.mxu0 %v993_v20  ;;  %v1028_v63 = vld [vmem:[#allocation5 + $0x1a8] sm:$0xff]   ;;  %v1029_v0 = vld [vmem:[#allocation5 + $0x170] sm:$0xff]   ;;  %v1033_v4 = vld [vmem:[#allocation5 + $0x178] sm:$0xff]  }
  0x4d   :  { %907 = vmatprep.subr.bf16.mxu1 %v994_v21  ;;  %v1030_v1 = vld [vmem:[#allocation5 + $0x1f0] sm:$0xff]   ;;  %v1034_v5 = vld [vmem:[#allocation5 + $0x1f8] sm:$0xff]   ;;  %v193_v18 = vld [vmem:[#allocation7] sm:$0xff] }
  0x4e   :  { %v1031_v2 = vld [vmem:[#allocation5 + $0x130] sm:$0xff]   ;;  %v1035_v6 = vld [vmem:[#allocation5 + $0x138] sm:$0xff]  }
  0x4f   :  { %886 = vmatpush3.bf16.msra.mxu0 %v995_v22  ;;  %v1032_v3 = vld [vmem:[#allocation5 + $0x1b0] sm:$0xff]   ;;  %v1036_v7 = vld [vmem:[#allocation5 + $0x1b8] sm:$0xff]  }
  0x50   :  { %908 = vmatpush3.bf16.msra.mxu1 %v996_v23  ;;  %887 = vmatprep.subr.bf16.mxu0 %v997_v24  ;;  %v59_v8 = vld [vmem:[#allocation2 + $0x10] sm:$0xff]  ;;  %v60_v12 = vld [vmem:[#allocation2 + $0x18] sm:$0xff] }
  0x51   :  { %909 = vmatprep.subr.bf16.mxu1 %v998_v25  ;;  %v63_v9 = vld [vmem:[#allocation2 + $0x30] sm:$0xff]  ;;  %v64_v13 = vld [vmem:[#allocation2 + $0x38] sm:$0xff]  ;;  %v194_v25 = vld [vmem:[#allocation7 + $0x8] sm:$0xff] }
  0x52   :  { %v807_v10 = vcombine.low %v59_v8, %v63_v9  ;;  %v808_v11 = vcombine.high %v59_v8, %v63_v9  ;;  %v809_v14 = vcombine.low %v60_v12, %v64_v13  ;;  %v810_v15 = vcombine.high %v60_v12, %v64_v13 }
  0x53   :  { %888 = vmatpush3.bf16.msra.mxu0 %v999_v26 }
  0x54   :  { %910 = vmatpush3.bf16.msra.mxu1 %v1000_v27  ;;  %889 = vmatprep.subr.bf16.mxu0 %v1001_v28 }
  0x55   :  { %911 = vmatprep.subr.bf16.mxu1 %v1002_v29 }
  0x57   :  { %890 = vmatpush3.bf16.msra.mxu0 %v1003_v30 }
  0x58   :  { %912 = vmatpush3.bf16.msra.mxu1 %v1004_v31  ;;  %919 = vmatprep.subr.bf16.mxu0 %v1005_v40 }
  0x59   :  { %941 = vmatprep.subr.bf16.mxu1 %v1006_v41 }
  0x5a   :  { %652 = vmatmul.mubr.bf16.vlgmr.msra.gmra.mrb[0].mxu0 %v803_v35 }
  0x5b   :  { %693 = vmatmul.mubr.bf16.vlgmr.msra.gmra.mrb[0].mxu1 %v805_v38  ;;  %920 = vmatpush3.bf16.msra.mxu0 %v1007_v42 }
  0x5c   :  { %942 = vmatpush3.bf16.msra.mxu1 %v1008_v43  ;;  %921 = vmatprep.subr.bf16.mxu0 %v1009_v44 }
  0x5d   :  { %943 = vmatprep.subr.bf16.mxu1 %v1010_v45  ;;  %733 = vmatprep.mubr.bf16.mxu0 %v808_v11 }
  0x5e   :  { %774 = vmatprep.mubr.bf16.mxu1 %v810_v15 }
  0x5f   :  { %922 = vmatpush3.bf16.msra.mxu0 %v1011_v46 }
  0x60   :  { %944 = vmatpush3.bf16.msra.mxu1 %v1012_v47  ;;  %923 = vmatprep.subr.bf16.mxu0 %v1013_v48 }
  0x61   :  { %945 = vmatprep.subr.bf16.mxu1 %v1014_v49 }
  0x63   :  { %924 = vmatpush3.bf16.msra.mxu0 %v1015_v50 }
  0x64   :  { %946 = vmatpush3.bf16.msra.mxu1 %v1016_v51  ;;  %925 = vmatprep.subr.bf16.mxu0 %v1017_v52 }
  0x65   :  { %947 = vmatprep.subr.bf16.mxu1 %v1018_v53 }
  0x67   :  { %926 = vmatpush3.bf16.msra.mxu0 %v1019_v54 }
  0x68   :  { %948 = vmatpush3.bf16.msra.mxu1 %v1020_v55  ;;  %927 = vmatprep.subr.bf16.mxu0 %v1021_v56 }
  0x69   :  { %949 = vmatprep.subr.bf16.mxu1 %v1022_v57 }
  0x6b   :  { %928 = vmatpush3.bf16.msra.mxu0 %v1023_v58 }
  0x6c   :  { %950 = vmatpush3.bf16.msra.mxu1 %v1024_v59  ;;  %929 = vmatprep.subr.bf16.mxu0 %v1025_v60 }
  0x6d   :  { %951 = vmatprep.subr.bf16.mxu1 %v1026_v61 }
  0x6f   :  { %930 = vmatpush3.bf16.msra.mxu0 %v1027_v62 }
  0x70   :  { %952 = vmatpush3.bf16.msra.mxu1 %v1028_v63  ;;  %931 = vmatprep.subr.bf16.mxu0 %v1029_v0 }
  0x71   :  { %953 = vmatprep.subr.bf16.mxu1 %v1030_v1 }
  0x73   :  { %932 = vmatpush3.bf16.msra.mxu0 %v1031_v2 }
  0x74   :  { %954 = vmatpush3.bf16.msra.mxu1 %v1032_v3  ;;  %933 = vmatprep.subr.bf16.mxu0 %v1033_v4 }
  0x75   :  { %955 = vmatprep.subr.bf16.mxu1 %v1034_v5 }
  0x77   :  { %934 = vmatpush3.bf16.msra.mxu0 %v1035_v6 }
  0x78   :  { %956 = vmatpush3.bf16.msra.mxu1 %v1036_v7 }
  0x7a   :  { %734 = vmatmul.mubr.bf16.vlgmr.msra.gmra.mrb[4].mxu0 %v807_v10 }
  0x7b   :  { %775 = vmatmul.mubr.bf16.vlgmr.msra.gmra.mrb[4].mxu1 %v809_v14 }
 0x12d   :  { %v891_v16 = vpop.f32.mrb[0].mxu0 }
 0x12e   :  { %v913_v17 = vpop.f32.mrb[0].mxu1  ;;  %v892_v19 = vpop.f32.mrb[1].mxu0 }
 0x12f   :  { %v893_v20 = vadd.f32 %v892_v19, %v891_v16  ;;  %v914_v21 = vpop.f32.mrb[1].mxu1  ;;  %v894_v22 = vpop.f32.mrb[2].mxu0 }
 0x130   :  { %v915_v23 = vadd.f32 %v914_v21, %v913_v17  ;;  %v916_v24 = vpop.f32.mrb[2].mxu1  ;;  %v895_v26 = vpop.f32.mrb[3].mxu0 }
 0x131   :  { %v654_v27 = vadd.f32 %v893_v20, %v193_v18  ;;  %v896_v28 = vadd.f32 %v895_v26, %v894_v22  ;;  %v917_v29 = vpop.f32.mrb[3].mxu1 }
 0x132   :  { %v918_v30 = vadd.f32 %v917_v29, %v916_v24 }
 0x133   :  { %v695_v31 = vadd.f32 %v915_v23, %v654_v27  ;;  %v657_v32 = vadd.f32 %v896_v28, %v194_v25 }
 0x135   :  { %v698_v33 = vadd.f32 %v918_v30, %v657_v32 }
 0x14d   :  { %v935_v34 = vpop.f32.mrb[4].mxu0 }
 0x14e   :  { %v957_v35 = vpop.f32.mrb[4].mxu1  ;;  %v936_v36 = vpop.f32.mrb[5].mxu0 }
 0x14f   :  { %v937_v37 = vadd.f32 %v936_v36, %v935_v34  ;;  %v958_v38 = vpop.f32.mrb[5].mxu1  ;;  %v938_v39 = vpop.f32.mrb[6].mxu0 }
 0x150   :  { %v959_v40 = vadd.f32 %v958_v38, %v957_v35  ;;  %v960_v41 = vpop.f32.mrb[6].mxu1  ;;  %v939_v42 = vpop.f32.mrb[7].mxu0 }
 0x151   :  { %v736_v43 = vadd.f32 %v937_v37, %v695_v31  ;;  %v940_v44 = vadd.f32 %v939_v42, %v938_v39  ;;  %v961_v45 = vpop.f32.mrb[7].mxu1 }
 0x152   :  { %v962_v46 = vadd.f32 %v961_v45, %v960_v41 }
 0x153   :  { %v777_v47 = vadd.f32 %v959_v40, %v736_v43  ;;  %v739_v48 = vadd.f32 %v940_v44, %v698_v33 }
 0x155   :  { %783 = vst [vmem:[#allocation8] sm:$0xff] %v777_v47  ;;  %v780_v49 = vadd.f32 %v962_v46, %v739_v48 }
 0x157   :  { %784 = vst [vmem:[#allocation8 + $0x8] sm:$0xff] %v780_v49 }
 0x158   :  { %1114 = shalt.err (!%p1111_p0)
}
 0x159   :  { %s1115_s29 = scalar_lea.hbm %s1218_s3, 256 }
 0x15a   :  { %p1116_p1 = scmp.ne.s32.totalorder %s1218_s3, %s1115_s29  ;;  %p1119_p2 = scmp.lt.u32.totalorder %s1115_s29, %s1218_s3 }
 0x15c   :  { %p1121_p3 = pnand %p1119_p2, %p1116_p1 }
 0x15e   :  { %1124 = shalt.err (!%p1121_p3)
}
 0x15f   :  { %796 = dma.vmem_to_hbm [thread:$0]  %s791_s25, 256, %s1218_s3, [#allocation4], %s1138_s0, %s1138_s0, %s1139_s22  }
 0x160   :  { %1129 = dma.done.wait [#allocation4], 256  }
 0x161   :  { %1130 = vsyncadd [#allocation4], 4294967040 }
 0x162   :  { %800 = vsyncpa [#allocation3], 1 }
 0x163   :  { %801 = vsyncpa [#allocation6], 1 }
 0x164   :  { %802 = vsyncpa [#allocation4], 1 }

</bundles_post_ra>
